<compile_context>
chip_gen: v7x
topology: tpu7x:2x2x1
jax: 0.10.0
libtpu: 0.0.40
codegen_flags: <defaults>
</compile_context>

<pallas_src>
import jax
import jax.numpy as jnp
import numpy as np
from jax import lax
from jax.experimental import pallas as pl
from jax.experimental.pallas import tpu as pltpu


# Raise v5e's 16 MiB scoped-VMEM default; comfortably inside v6e (128 MiB) and v7x (64 MiB).
_COMPILER_PARAMS = pltpu.CompilerParams(
    dimension_semantics=("parallel",),
    vmem_limit_bytes=32 * 1024 * 1024,
)


def _pick_nb(n, *, min_grid_steps=2, max_nb=8):
    """Images per grid step: as large as possible while dividing N exactly and keeping at
    least `min_grid_steps` grid steps so both v7x TensorCores get work.  max_nb keeps the
    double-buffered blocks well inside VMEM at these resolutions."""
    nb = 1
    for cand in range(1, max_nb + 1):
        if n % cand == 0 and n // cand >= min_grid_steps:
            nb = cand
    return nb


# ----------------------------------------------------------------------------
# K1: maxpool2x2 + fused (depthwise o pointwise) conv-1 + bias + BN1 partial sums
# ----------------------------------------------------------------------------
def fused_block1(x_nhwc, wc, beff, *, Hp, Wp, nb):
    """x_nhwc: (N,H,W,Cin) f32.  wc: (9*Cin, Cout) combined weight (row k*Cin+ci =
    dw[ci,k]*pw[:,ci]) in compute dtype.  beff: (1,Cout) f32 effective bias.
    Returns y (N*Hp*Wp, Cout) pre-BN in compute dtype, and per-step stats (G,1,Cout) f32."""
    N, H, W, Cin = x_nhwc.shape
    KC, Cout = wc.shape
    cdt = wc.dtype
    G = N // nb
    HW = Hp * Wp
    M = nb * HW
    # Free metadata reshape: the two W-neighbours of each pool window become the two halves
    # of the last dim, so the in-kernel pooling gather needs no strided slices.
    x_r = x_nhwc.reshape(N, H, Wp, 2 * Cin)

    def kernel(x_ref, w_ref, b_ref, y_ref, s_ref, q_ref, pad_ref, col_ref):
        # Halo-only zeroing, every step (per-core scratch: never gate on program_id == 0).
        zr = jnp.zeros((nb, 1, Wp + 2, Cin), cdt)
        zc = jnp.zeros((nb, Hp + 2, 1, Cin), cdt)
        pad_ref[:, 0:1, :, :] = zr
        pad_ref[:, Hp + 1:Hp + 2, :, :] = zr
        pad_ref[:, :, 0:1, :] = zc
        pad_ref[:, :, Wp + 1:Wp + 2, :] = zc

        # 2x2 max pool per image, written straight into the padded-tile interior (bf16).
        for b in range(nb):
            xt = x_ref[b]                                   # (H, Wp, 2*Cin) f32
            t = xt.reshape(Hp, 2, Wp, 2 * Cin)              # major-dim split: free
            rm = jnp.maximum(t[:, 0], t[:, 1])              # row pairs
            pooled = jnp.maximum(rm[..., :Cin], rm[..., Cin:])   # col pairs (Hp, Wp, Cin)
            pad_ref[b, 1:Hp + 1, 1:Wp + 1, :] = pooled.astype(cdt)

        # im2col: the 9 shifted views are written once into the (M, 9*Cin) scratch, then
        # ONE matmul contracts K = 9*Cin (bf16 inputs, f32 accumulation on the MXU).
        for b in range(nb):
            m0 = b * HW
            for k in range(9):
                dy, dx = k // 3, k % 3
                col_ref[m0:m0 + HW, k * Cin:(k + 1) * Cin] = (
                    pad_ref[b, dy:dy + Hp, dx:dx + Wp, :].reshape(HW, Cin))

        acc = jnp.dot(col_ref[...], w_ref[...],
                      preferred_element_type=jnp.float32)    # (M, Cout) f32
        acc = acc + b_ref[...]

        y_ref[...] = acc.astype(y_ref.dtype)
        # BN partial sums fused in the same pass (no extra HBM read of the activation).
        s_ref[0] = jnp.sum(acc, axis=0, keepdims=True)
        q_ref[0] = jnp.sum(acc * acc, axis=0, keepdims=True)

    return pl.pallas_call(
        kernel,
        out_shape=(jax.ShapeDtypeStruct((N * HW, Cout), cdt),
                   jax.ShapeDtypeStruct((G, 1, Cout), jnp.float32),
                   jax.ShapeDtypeStruct((G, 1, Cout), jnp.float32)),
        grid=(G,),
        in_specs=[pl.BlockSpec((nb, H, Wp, 2 * Cin), lambda n: (n, 0, 0, 0)),
                  pl.BlockSpec((KC, Cout), lambda n: (0, 0)),
                  pl.BlockSpec((1, Cout), lambda n: (0, 0))],
        out_specs=(pl.BlockSpec((M, Cout), lambda n: (n, 0)),
                   pl.BlockSpec((1, 1, Cout), lambda n: (n, 0, 0)),
                   pl.BlockSpec((1, 1, Cout), lambda n: (n, 0, 0))),
        scratch_shapes=[pltpu.VMEM((nb, Hp + 2, Wp + 2, Cin), cdt),
                        pltpu.VMEM((M, 9 * Cin), cdt)],
        compiler_params=_COMPILER_PARAMS,
    )(x_r, wc, beff)


# ----------------------------------------------------------------------------
# K2: BN1-apply + ReLU fused into conv-2 (same single-matmul fused conv) + BN2 partial sums
# ----------------------------------------------------------------------------
def fused_block2(y1, scale1, shift1, wc, beff, *, Hp, Wp, nb):
    MN, Cmid = y1.shape                                     # MN = N*Hp*Wp
    KC, Cout = wc.shape
    cdt = wc.dtype
    HW = Hp * Wp
    M = nb * HW
    G = MN // M

    def kernel(y_ref, sc_ref, sh_ref, w_ref, b_ref, o_ref, s_ref, q_ref, pad_ref, col_ref):
        zr = jnp.zeros((nb, 1, Wp + 2, Cmid), cdt)
        zc = jnp.zeros((nb, Hp + 2, 1, Cmid), cdt)
        pad_ref[:, 0:1, :, :] = zr
        pad_ref[:, Hp + 1:Hp + 2, :, :] = zr
        pad_ref[:, :, 0:1, :] = zc
        pad_ref[:, :, Wp + 1:Wp + 2, :] = zc

        # BN1 + ReLU applied on the fly to the previous block's pre-BN bf16 activation.
        a = jnp.maximum(y_ref[...].astype(jnp.float32) * sc_ref[...] + sh_ref[...], 0.0)
        a = a.astype(cdt)                                   # (M, Cmid)

        for b in range(nb):
            m0 = b * HW
            pad_ref[b, 1:Hp + 1, 1:Wp + 1, :] = a[m0:m0 + HW, :].reshape(Hp, Wp, Cmid)
        for b in range(nb):
            m0 = b * HW
            for k in range(9):
                dy, dx = k // 3, k % 3
                col_ref[m0:m0 + HW, k * Cmid:(k + 1) * Cmid] = (
                    pad_ref[b, dy:dy + Hp, dx:dx + Wp, :].reshape(HW, Cmid))

        acc = jnp.dot(col_ref[...], w_ref[...], preferred_element_type=jnp.float32)
        acc = acc + b_ref[...]

        o_ref[...] = acc.astype(o_ref.dtype)
        s_ref[0] = jnp.sum(acc, axis=0, keepdims=True)
        q_ref[0] = jnp.sum(acc * acc, axis=0, keepdims=True)

    return pl.pallas_call(
        kernel,
        out_shape=(jax.ShapeDtypeStruct((MN, Cout), cdt),
                   jax.ShapeDtypeStruct((G, 1, Cout), jnp.float32),
                   jax.ShapeDtypeStruct((G, 1, Cout), jnp.float32)),
        grid=(G,),
        in_specs=[pl.BlockSpec((M, Cmid), lambda n: (n, 0)),
                  pl.BlockSpec((1, Cmid), lambda n: (0, 0)),
                  pl.BlockSpec((1, Cmid), lambda n: (0, 0)),
                  pl.BlockSpec((KC, Cout), lambda n: (0, 0)),
                  pl.BlockSpec((1, Cout), lambda n: (0, 0))],
        out_specs=(pl.BlockSpec((M, Cout), lambda n: (n, 0)),
                   pl.BlockSpec((1, 1, Cout), lambda n: (n, 0, 0)),
                   pl.BlockSpec((1, 1, Cout), lambda n: (n, 0, 0))),
        scratch_shapes=[pltpu.VMEM((nb, Hp + 2, Wp + 2, Cmid), cdt),
                        pltpu.VMEM((M, 9 * Cmid), cdt)],
        compiler_params=_COMPILER_PARAMS,
    )(y1, scale1, shift1, wc, beff)


# ----------------------------------------------------------------------------
# K3: final BN2-apply + ReLU, lane-dense flattened (last dim = Hp*Wp*C >= 128)
# ----------------------------------------------------------------------------
def bn_relu_flat(y2, scale, shift, *, Hp, Wp, nb):
    MN, C = y2.shape
    HW = Hp * Wp
    N = MN // HW
    F = HW * C
    G = N // nb
    y_flat = y2.reshape(N, 1, F)                      # free HBM-level metadata reshape
    sc = jnp.tile(scale, HW).reshape(1, 1, F)         # channel-periodic broadcast (tiny)
    sh = jnp.tile(shift, HW).reshape(1, 1, F)

    def kernel(y_ref, sc_ref, sh_ref, o_ref):
        o_ref[...] = jnp.maximum(
            y_ref[...].astype(jnp.float32) * sc_ref[...] + sh_ref[...], 0.0)

    out = pl.pallas_call(
        kernel,
        out_shape=jax.ShapeDtypeStruct((N, 1, F), jnp.float32),
        grid=(G,),
        in_specs=[pl.BlockSpec((nb, 1, F), lambda n: (n, 0, 0)),
                  pl.BlockSpec((1, 1, F), lambda n: (0, 0, 0)),
                  pl.BlockSpec((1, 1, F), lambda n: (0, 0, 0))],
        out_specs=pl.BlockSpec((nb, 1, F), lambda n: (n, 0, 0)),
        compiler_params=_COMPILER_PARAMS,
    )(y_flat, sc, sh)
    return out.reshape(N, Hp, Wp, C)


# ----------------------------------------------------------------------------
# BN glue: fold per-step (sum, sumsq) into per-channel scale/shift (tiny (C,) math)
# ----------------------------------------------------------------------------
def _bn_fold(s, q, gamma, beta, cnt, eps):
    s_tot = jnp.sum(s, axis=(0, 1))                   # (C,)
    q_tot = jnp.sum(q, axis=(0, 1))
    mean = s_tot / cnt
    # TODO(synk): shifted/Welford accumulation if activation magnitudes grow at prod scale.
    var = q_tot / cnt - mean * mean                   # training-mode batch stats (biased)
    scale = gamma * lax.rsqrt(var + eps)
    shift = beta - mean * scale
    return scale, shift


# ----------------------------------------------------------------------------
# ReDown forward (Pallas path)
# ----------------------------------------------------------------------------
def redown_forward(x_nchw, params, eps=1e-5):
    N, Cin, H, W = x_nchw.shape
    assert H % 2 == 0 and W % 2 == 0, "MaxPool2d(2) expects even spatial dims"
    Hp, Wp = H // 2, W // 2
    nb = _pick_nb(N)

    x = jnp.transpose(x_nchw, (0, 2, 3, 1))           # NCHW -> NHWC boundary glue

    y1, s1, q1 = fused_block1(x, params["wc1"], params["beff1"], Hp=Hp, Wp=Wp, nb=nb)
    scale1, shift1 = _bn_fold(s1, q1, params["bn1_g"], params["bn1_b"], N * Hp * Wp, eps)

    y2, s2, q2 = fused_block2(y1, scale1[None, :], shift1[None, :],
                              params["wc2"], params["beff2"], Hp=Hp, Wp=Wp, nb=nb)
    scale2, shift2 = _bn_fold(s2, q2, params["bn2_g"], params["bn2_b"], N * Hp * Wp, eps)

    out = bn_relu_flat(y2, scale2, shift2, Hp=Hp, Wp=Wp, nb=nb)
    # TODO(synk): fold this boundary transpose into K3's store path for production C.
    return jnp.transpose(out, (0, 3, 1, 2))           # NHWC -> NCHW boundary glue


# ----------------------------------------------------------------------------
# Pure-JAX reference (mirrors the PyTorch module, NCHW, training-mode BN)
# ----------------------------------------------------------------------------
def redown_reference(x, p, eps=1e-5):
    def dwconv(x, w, b):
        C = x.shape[1]
        y = lax.conv_general_dilated(x, w, (1, 1), [(1, 1), (1, 1)],
                                     feature_group_count=C,
                                     dimension_numbers=('NCHW', 'OIHW', 'NCHW'))
        return y + b[None, :, None, None]

    def pwconv(x, w, b):
        y = lax.conv_general_dilated(x, w, (1, 1), [(0, 0), (0, 0)],
                                     dimension_numbers=('NCHW', 'OIHW', 'NCHW'))
        return y + b[None, :, None, None]

    def bn_relu(x, g, b):
        mean = x.mean(axis=(0, 2, 3), keepdims=True)
        var = x.var(axis=(0, 2, 3), keepdims=True)
        y = (x - mean) / jnp.sqrt(var + eps)
        y = y * g[None, :, None, None] + b[None, :, None, None]
        return jnp.maximum(y, 0.0)

    x = lax.reduce_window(x, -jnp.inf, lax.max, (1, 1, 2, 2), (1, 1, 2, 2), 'VALID')
    x = bn_relu(pwconv(dwconv(x, p["dw1_w"], p["dw1_bias"]), p["pw1_wt"], p["pw1_bias"]),
                p["bn1_g"], p["bn1_b"])
    x = bn_relu(pwconv(dwconv(x, p["dw2_w"], p["dw2_bias"]), p["pw2_wt"], p["pw2_bias"]),
                p["bn2_g"], p["bn2_b"])
    return x


# ----------------------------------------------------------------------------
# Deterministic parameter init + kernel-layout (flattened combined dw*pw) weights
# ----------------------------------------------------------------------------
def make_raw_params(key, cin, cout):
    ks = jax.random.split(key, 8)

    def rnd(k, shape, s):
        # Round test weights to bf16-representable values so the bf16 kernel path can be
        # compared to the f32 reference with most quantization noise removed.
        v = jax.random.normal(k, shape, jnp.float32) * s
        return v.astype(jnp.bfloat16).astype(jnp.float32)

    return {
        "dw1_w": rnd(ks[0], (cin, 1, 3, 3), 0.2),
        "dw1_bias": rnd(ks[1], (cin,), 0.1),
        "pw1_wt": rnd(ks[2], (cout, cin, 1, 1), 0.2),
        "pw1_bias": rnd(ks[3], (cout,), 0.1),
        "dw2_w": rnd(ks[4], (cout, 1, 3, 3), 0.2),
        "dw2_bias": rnd(ks[5], (cout,), 0.1),
        "pw2_wt": rnd(ks[6], (cout, cout, 1, 1), 0.2),
        "pw2_bias": rnd(ks[7], (cout,), 0.1),
        "bn1_g": jnp.ones((cout,), jnp.float32),
        "bn1_b": jnp.zeros((cout,), jnp.float32),
        "bn2_g": jnp.ones((cout,), jnp.float32),
        "bn2_b": jnp.zeros((cout,), jnp.float32),
    }


def make_kernel_params(raw, compute_dtype=jnp.bfloat16):
    def combine(dw_w, dw_b, pw_w, pw_b):
        c = dw_w.shape[0]
        cout = pw_w.shape[0]
        w9 = jnp.transpose(dw_w.reshape(c, 9), (1, 0))          # (9, C)   tap-major
        pw = jnp.transpose(pw_w[:, :, 0, 0], (1, 0))            # (C, Cout)
        wc = (w9[:, :, None] * pw[None, :, :]).reshape(9 * c, cout)   # row = k*C + ci
        beff = (pw_b + dw_b @ pw)[None, :]                      # (1, Cout), stays f32
        return wc.astype(compute_dtype), beff.astype(jnp.float32)

    wc1, beff1 = combine(raw["dw1_w"], raw["dw1_bias"], raw["pw1_wt"], raw["pw1_bias"])
    wc2, beff2 = combine(raw["dw2_w"], raw["dw2_bias"], raw["pw2_wt"], raw["pw2_bias"])
    return {"wc1": wc1, "beff1": beff1, "wc2": wc2, "beff2": beff2,
            "bn1_g": raw["bn1_g"], "bn1_b": raw["bn1_b"],
            "bn2_g": raw["bn2_g"], "bn2_b": raw["bn2_b"]}


if __name__ == "__main__":
    key = jax.random.PRNGKey(0)
    k_param, k_x = jax.random.split(key)

    in_channels, out_channels = 4, 8
    x = jax.random.normal(k_x, (2, in_channels, 16, 16), jnp.float32)   # NCHW
    # bf16-representable input so the bf16 path is compared without input-rounding noise.
    x = x.astype(jnp.bfloat16).astype(jnp.float32)

    raw = make_raw_params(k_param, in_channels, out_channels)
    ref = jax.block_until_ready(redown_reference(x, raw))

    # f32 compute path: strict numerical parity with the PyTorch-equivalent reference.
    out_f32 = jax.block_until_ready(redown_forward(x, make_kernel_params(raw, jnp.float32)))
    assert out_f32.shape == (2, out_channels, 8, 8), out_f32.shape
    np.testing.assert_allclose(np.asarray(out_f32), np.asarray(ref), rtol=2e-4, atol=2e-4)

    # bf16 production path (bf16 matmul inputs + bf16 inter-kernel activations, f32
    # accumulation & BN statistics): loose tolerance covers the bf16 activation rounding.
    out_bf16 = jax.block_until_ready(redown_forward(x, make_kernel_params(raw, jnp.bfloat16)))
    assert out_bf16.shape == (2, out_channels, 8, 8), out_bf16.shape
    err = np.abs(np.asarray(out_bf16) - np.asarray(ref))
    assert float(err.max()) < 1e-1 and float(err.mean()) < 2e-2, (err.max(), err.mean())

    print("KERNEL_OK")
</pallas_src>

<mosaic_0001>
module attributes {stable_mosaic.version = 11 : i64} {
  func.func @kernel(%arg0: i32, %arg1: memref<1x16x8x8xf32, #tpu.memory_space<vmem>>, %arg2: memref<36x8xf32, #tpu.memory_space<vmem>>, %arg3: memref<1x8xf32, #tpu.memory_space<vmem>>, %arg4: memref<64x8xf32, #tpu.memory_space<vmem>>, %arg5: memref<1x1x8xf32, #tpu.memory_space<vmem>>, %arg6: memref<1x1x8xf32, #tpu.memory_space<vmem>>, %arg7: memref<1x10x10x4xf32, #tpu.memory_space<vmem>>, %arg8: memref<64x36xf32, #tpu.memory_space<vmem>>) attributes {dimension_semantics = [#tpu.dimension_semantics<parallel>], iteration_bounds = array<i64: 2>, scalar_prefetch = 0 : i64, scratch_operands = 2 : i64, tpu.core_type = #tpu.core_type<tc>, window_params = [{transform_indices = @transform_0, window_bounds = array<i64: 1, 16, 8, 8>}, {pipeline_mode = #tpu.pipeline_mode<synchronous>, transform_indices = @transform_1, window_bounds = array<i64: 36, 8>}, {pipeline_mode = #tpu.pipeline_mode<synchronous>, transform_indices = @transform_2, window_bounds = array<i64: 1, 8>}, {transform_indices = @transform_3, window_bounds = array<i64: 64, 8>}, {transform_indices = @transform_4, window_bounds = array<i64: 1, 1, 8>}, {transform_indices = @transform_5, window_bounds = array<i64: 1, 1, 8>}]} {
    %cst = arith.constant 0.000000e+00 : f32
    %0 = vector.broadcast %cst : f32 to vector<1x1x10x4xf32>
    %cst_0 = arith.constant 0.000000e+00 : f32
    %1 = vector.broadcast %cst_0 : f32 to vector<1x10x1x4xf32>
    %c0 = arith.constant 0 : index
    %c0_1 = arith.constant 0 : index
    %c0_2 = arith.constant 0 : index
    %c0_3 = arith.constant 0 : index
    %2 = vector.load %arg7[%c0, %c0_1, %c0_2, %c0_3] : memref<1x10x10x4xf32, #tpu.memory_space<vmem>>, vector<1x1x10x4xf32>
    tpu.vector_store %arg7[%c0, %c0_1, %c0_2, %c0_3], %0 {strides = array<i32>} : memref<1x10x10x4xf32, #tpu.memory_space<vmem>>, vector<1x1x10x4xf32>,
    %c0_4 = arith.constant 0 : index
    %c9 = arith.constant 9 : index
    %c0_5 = arith.constant 0 : index
    %c0_6 = arith.constant 0 : index
    %3 = vector.load %arg7[%c0_4, %c9, %c0_5, %c0_6] : memref<1x10x10x4xf32, #tpu.memory_space<vmem>>, vector<1x1x10x4xf32>
    tpu.vector_store %arg7[%c0_4, %c9, %c0_5, %c0_6], %0 {strides = array<i32>} : memref<1x10x10x4xf32, #tpu.memory_space<vmem>>, vector<1x1x10x4xf32>,
    %c0_7 = arith.constant 0 : index
    %c0_8 = arith.constant 0 : index
    %c0_9 = arith.constant 0 : index
    %c0_10 = arith.constant 0 : index
    %4 = vector.load %arg7[%c0_7, %c0_8, %c0_9, %c0_10] : memref<1x10x10x4xf32, #tpu.memory_space<vmem>>, vector<1x10x1x4xf32>
    tpu.vector_store %arg7[%c0_7, %c0_8, %c0_9, %c0_10], %1 {strides = array<i32>} : memref<1x10x10x4xf32, #tpu.memory_space<vmem>>, vector<1x10x1x4xf32>,
    %c0_11 = arith.constant 0 : index
    %c0_12 = arith.constant 0 : index
    %c9_13 = arith.constant 9 : index
    %c0_14 = arith.constant 0 : index
    %5 = vector.load %arg7[%c0_11, %c0_12, %c9_13, %c0_14] : memref<1x10x10x4xf32, #tpu.memory_space<vmem>>, vector<1x10x1x4xf32>
    tpu.vector_store %arg7[%c0_11, %c0_12, %c9_13, %c0_14], %1 {strides = array<i32>} : memref<1x10x10x4xf32, #tpu.memory_space<vmem>>, vector<1x10x1x4xf32>,
    %c0_15 = arith.constant 0 : index
    %c0_16 = arith.constant 0 : index
    %c0_17 = arith.constant 0 : index
    %c0_18 = arith.constant 0 : index
    %6 = vector.load %arg1[%c0_15, %c0_16, %c0_17, %c0_18] : memref<1x16x8x8xf32, #tpu.memory_space<vmem>>, vector<1x16x8x8xf32>
    %7 = vector.shape_cast %6 : vector<1x16x8x8xf32> to vector<16x8x8xf32>
    %8 = vector.shape_cast %7 : vector<16x8x8xf32> to vector<8x2x8x8xf32>
    %9 = vector.extract_strided_slice %8 {offsets = [0, 0, 0, 0], sizes = [8, 1, 8, 8], strides = [1, 1, 1, 1]} : vector<8x2x8x8xf32> to vector<8x1x8x8xf32>
    %10 = vector.shape_cast %9 : vector<8x1x8x8xf32> to vector<8x8x8xf32>
    %11 = vector.extract_strided_slice %8 {offsets = [0, 1, 0, 0], sizes = [8, 1, 8, 8], strides = [1, 1, 1, 1]} : vector<8x2x8x8xf32> to vector<8x1x8x8xf32>
    %12 = vector.shape_cast %11 : vector<8x1x8x8xf32> to vector<8x8x8xf32>
    %13 = arith.maximumf %10, %12 : vector<8x8x8xf32>
    %14 = vector.extract_strided_slice %13 {offsets = [0, 0, 0], sizes = [8, 8, 4], strides = [1, 1, 1]} : vector<8x8x8xf32> to vector<8x8x4xf32>
    %15 = vector.extract_strided_slice %13 {offsets = [0, 0, 4], sizes = [8, 8, 4], strides = [1, 1, 1]} : vector<8x8x8xf32> to vector<8x8x4xf32>
    %16 = arith.maximumf %14, %15 : vector<8x8x4xf32>
    %c0_19 = arith.constant 0 : index
    %c1 = arith.constant 1 : index
    %c1_20 = arith.constant 1 : index
    %c0_21 = arith.constant 0 : index
    %17 = vector.load %arg7[%c0_19, %c1, %c1_20, %c0_21] : memref<1x10x10x4xf32, #tpu.memory_space<vmem>>, vector<1x8x8x4xf32>
    %18 = vector.shape_cast %17 : vector<1x8x8x4xf32> to vector<8x8x4xf32>
    %19 = vector.shape_cast %16 : vector<8x8x4xf32> to vector<1x8x8x4xf32>
    tpu.vector_store %arg7[%c0_19, %c1, %c1_20, %c0_21], %19 {strides = array<i32>} : memref<1x10x10x4xf32, #tpu.memory_space<vmem>>, vector<1x8x8x4xf32>,
    %c0_22 = arith.constant 0 : index
    %c0_23 = arith.constant 0 : index
    %c0_24 = arith.constant 0 : index
    %c0_25 = arith.constant 0 : index
    %20 = vector.load %arg7[%c0_22, %c0_23, %c0_24, %c0_25] : memref<1x10x10x4xf32, #tpu.memory_space<vmem>>, vector<1x8x8x4xf32>
    %21 = vector.shape_cast %20 : vector<1x8x8x4xf32> to vector<8x8x4xf32>
    %22 = vector.shape_cast %21 : vector<8x8x4xf32> to vector<64x4xf32>
    %c0_26 = arith.constant 0 : index
    %c0_27 = arith.constant 0 : index
    %23 = vector.load %arg8[%c0_26, %c0_27] : memref<64x36xf32, #tpu.memory_space<vmem>>, vector<64x4xf32>
    tpu.vector_store %arg8[%c0_26, %c0_27], %22 {strides = array<i32>} : memref<64x36xf32, #tpu.memory_space<vmem>>, vector<64x4xf32>,
    %c0_28 = arith.constant 0 : index
    %c0_29 = arith.constant 0 : index
    %c1_30 = arith.constant 1 : index
    %c0_31 = arith.constant 0 : index
    %24 = vector.load %arg7[%c0_28, %c0_29, %c1_30, %c0_31] : memref<1x10x10x4xf32, #tpu.memory_space<vmem>>, vector<1x8x8x4xf32>
    %25 = vector.shape_cast %24 : vector<1x8x8x4xf32> to vector<8x8x4xf32>
    %26 = vector.shape_cast %25 : vector<8x8x4xf32> to vector<64x4xf32>
    %c0_32 = arith.constant 0 : index
    %c4 = arith.constant 4 : index
    %27 = vector.load %arg8[%c0_32, %c4] : memref<64x36xf32, #tpu.memory_space<vmem>>, vector<64x4xf32>
    tpu.vector_store %arg8[%c0_32, %c4], %26 {strides = array<i32>} : memref<64x36xf32, #tpu.memory_space<vmem>>, vector<64x4xf32>,
    %c0_33 = arith.constant 0 : index
    %c0_34 = arith.constant 0 : index
    %c2 = arith.constant 2 : index
    %c0_35 = arith.constant 0 : index
    %28 = vector.load %arg7[%c0_33, %c0_34, %c2, %c0_35] : memref<1x10x10x4xf32, #tpu.memory_space<vmem>>, vector<1x8x8x4xf32>
    %29 = vector.shape_cast %28 : vector<1x8x8x4xf32> to vector<8x8x4xf32>
    %30 = vector.shape_cast %29 : vector<8x8x4xf32> to vector<64x4xf32>
    %c0_36 = arith.constant 0 : index
    %c8 = arith.constant 8 : index
    %31 = vector.load %arg8[%c0_36, %c8] : memref<64x36xf32, #tpu.memory_space<vmem>>, vector<64x4xf32>
    tpu.vector_store %arg8[%c0_36, %c8], %30 {strides = array<i32>} : memref<64x36xf32, #tpu.memory_space<vmem>>, vector<64x4xf32>,
    %c0_37 = arith.constant 0 : index
    %c1_38 = arith.constant 1 : index
    %c0_39 = arith.constant 0 : index
    %c0_40 = arith.constant 0 : index
    %32 = vector.load %arg7[%c0_37, %c1_38, %c0_39, %c0_40] : memref<1x10x10x4xf32, #tpu.memory_space<vmem>>, vector<1x8x8x4xf32>
    %33 = vector.shape_cast %32 : vector<1x8x8x4xf32> to vector<8x8x4xf32>
    %34 = vector.shape_cast %33 : vector<8x8x4xf32> to vector<64x4xf32>
    %c0_41 = arith.constant 0 : index
    %c12 = arith.constant 12 : index
    %35 = vector.load %arg8[%c0_41, %c12] : memref<64x36xf32, #tpu.memory_space<vmem>>, vector<64x4xf32>
    tpu.vector_store %arg8[%c0_41, %c12], %34 {strides = array<i32>} : memref<64x36xf32, #tpu.memory_space<vmem>>, vector<64x4xf32>,
    %c0_42 = arith.constant 0 : index
    %c1_43 = arith.constant 1 : index
    %c1_44 = arith.constant 1 : index
    %c0_45 = arith.constant 0 : index
    %36 = vector.load %arg7[%c0_42, %c1_43, %c1_44, %c0_45] : memref<1x10x10x4xf32, #tpu.memory_space<vmem>>, vector<1x8x8x4xf32>
    %37 = vector.shape_cast %36 : vector<1x8x8x4xf32> to vector<8x8x4xf32>
    %38 = vector.shape_cast %37 : vector<8x8x4xf32> to vector<64x4xf32>
    %c0_46 = arith.constant 0 : index
    %c16 = arith.constant 16 : index
    %39 = vector.load %arg8[%c0_46, %c16] : memref<64x36xf32, #tpu.memory_space<vmem>>, vector<64x4xf32>
    tpu.vector_store %arg8[%c0_46, %c16], %38 {strides = array<i32>} : memref<64x36xf32, #tpu.memory_space<vmem>>, vector<64x4xf32>,
    %c0_47 = arith.constant 0 : index
    %c1_48 = arith.constant 1 : index
    %c2_49 = arith.constant 2 : index
    %c0_50 = arith.constant 0 : index
    %40 = vector.load %arg7[%c0_47, %c1_48, %c2_49, %c0_50] : memref<1x10x10x4xf32, #tpu.memory_space<vmem>>, vector<1x8x8x4xf32>
    %41 = vector.shape_cast %40 : vector<1x8x8x4xf32> to vector<8x8x4xf32>
    %42 = vector.shape_cast %41 : vector<8x8x4xf32> to vector<64x4xf32>
    %c0_51 = arith.constant 0 : index
    %c20 = arith.constant 20 : index
    %43 = vector.load %arg8[%c0_51, %c20] : memref<64x36xf32, #tpu.memory_space<vmem>>, vector<64x4xf32>
    tpu.vector_store %arg8[%c0_51, %c20], %42 {strides = array<i32>} : memref<64x36xf32, #tpu.memory_space<vmem>>, vector<64x4xf32>,
    %c0_52 = arith.constant 0 : index
    %c2_53 = arith.constant 2 : index
    %c0_54 = arith.constant 0 : index
    %c0_55 = arith.constant 0 : index
    %44 = vector.load %arg7[%c0_52, %c2_53, %c0_54, %c0_55] : memref<1x10x10x4xf32, #tpu.memory_space<vmem>>, vector<1x8x8x4xf32>
    %45 = vector.shape_cast %44 : vector<1x8x8x4xf32> to vector<8x8x4xf32>
    %46 = vector.shape_cast %45 : vector<8x8x4xf32> to vector<64x4xf32>
    %c0_56 = arith.constant 0 : index
    %c24 = arith.constant 24 : index
    %47 = vector.load %arg8[%c0_56, %c24] : memref<64x36xf32, #tpu.memory_space<vmem>>, vector<64x4xf32>
    tpu.vector_store %arg8[%c0_56, %c24], %46 {strides = array<i32>} : memref<64x36xf32, #tpu.memory_space<vmem>>, vector<64x4xf32>,
    %c0_57 = arith.constant 0 : index
    %c2_58 = arith.constant 2 : index
    %c1_59 = arith.constant 1 : index
    %c0_60 = arith.constant 0 : index
    %48 = vector.load %arg7[%c0_57, %c2_58, %c1_59, %c0_60] : memref<1x10x10x4xf32, #tpu.memory_space<vmem>>, vector<1x8x8x4xf32>
    %49 = vector.shape_cast %48 : vector<1x8x8x4xf32> to vector<8x8x4xf32>
    %50 = vector.shape_cast %49 : vector<8x8x4xf32> to vector<64x4xf32>
    %c0_61 = arith.constant 0 : index
    %c28 = arith.constant 28 : index
    %51 = vector.load %arg8[%c0_61, %c28] : memref<64x36xf32, #tpu.memory_space<vmem>>, vector<64x4xf32>
    tpu.vector_store %arg8[%c0_61, %c28], %50 {strides = array<i32>} : memref<64x36xf32, #tpu.memory_space<vmem>>, vector<64x4xf32>,
    %c0_62 = arith.constant 0 : index
    %c2_63 = arith.constant 2 : index
    %c2_64 = arith.constant 2 : index
    %c0_65 = arith.constant 0 : index
    %52 = vector.load %arg7[%c0_62, %c2_63, %c2_64, %c0_65] : memref<1x10x10x4xf32, #tpu.memory_space<vmem>>, vector<1x8x8x4xf32>
    %53 = vector.shape_cast %52 : vector<1x8x8x4xf32> to vector<8x8x4xf32>
    %54 = vector.shape_cast %53 : vector<8x8x4xf32> to vector<64x4xf32>
    %c0_66 = arith.constant 0 : index
    %c32 = arith.constant 32 : index
    %55 = vector.load %arg8[%c0_66, %c32] : memref<64x36xf32, #tpu.memory_space<vmem>>, vector<64x4xf32>
    tpu.vector_store %arg8[%c0_66, %c32], %54 {strides = array<i32>} : memref<64x36xf32, #tpu.memory_space<vmem>>, vector<64x4xf32>,
    %c0_67 = arith.constant 0 : index
    %c0_68 = arith.constant 0 : index
    %56 = vector.load %arg8[%c0_67, %c0_68] : memref<64x36xf32, #tpu.memory_space<vmem>>, vector<64x36xf32>
    %c0_69 = arith.constant 0 : index
    %c0_70 = arith.constant 0 : index
    %57 = vector.load %arg2[%c0_69, %c0_70] : memref<36x8xf32, #tpu.memory_space<vmem>>, vector<36x8xf32>
    %cst_71 = arith.constant dense<0.000000e+00> : vector<64x8xf32>
    %58 = tpu.matmul %56, %57, %cst_71 {dimension_numbers = #tpu.dot_dimension_numbers<[1], [0], [0], [1], [0, 0, 1, 1], [], []>} : vector<64x36xf32>, vector<36x8xf32>, vector<64x8xf32> -> vector<64x8xf32>
    %c0_72 = arith.constant 0 : index
    %c0_73 = arith.constant 0 : index
    %59 = vector.load %arg3[%c0_72, %c0_73] : memref<1x8xf32, #tpu.memory_space<vmem>>, vector<1x8xf32>
    %60 = vector.broadcast %59 : vector<1x8xf32> to vector<64x8xf32>
    %61 = arith.addf %58, %60 : vector<64x8xf32>
    %c0_74 = arith.constant 0 : index
    %c0_75 = arith.constant 0 : index
    %62 = vector.load %arg4[%c0_74, %c0_75] : memref<64x8xf32, #tpu.memory_space<vmem>>, vector<64x8xf32>
    tpu.vector_store %arg4[%c0_74, %c0_75], %61 {strides = array<i32>} : memref<64x8xf32, #tpu.memory_space<vmem>>, vector<64x8xf32>,
    %cst_76 = arith.constant dense<0.000000e+00> : vector<8xf32>
    %63 = vector.multi_reduction <add>, %61, %cst_76 [0] : vector<64x8xf32> to vector<8xf32>
    %64 = vector.shape_cast %63 : vector<8xf32> to vector<1x8xf32>
    %c0_77 = arith.constant 0 : index
    %c0_78 = arith.constant 0 : index
    %c0_79 = arith.constant 0 : index
    %65 = vector.load %arg5[%c0_77, %c0_78, %c0_79] : memref<1x1x8xf32, #tpu.memory_space<vmem>>, vector<1x1x8xf32>
    %66 = vector.shape_cast %65 : vector<1x1x8xf32> to vector<1x8xf32>
    %67 = vector.shape_cast %64 : vector<1x8xf32> to vector<1x1x8xf32>
    tpu.vector_store %arg5[%c0_77, %c0_78, %c0_79], %67 {strides = array<i32>} : memref<1x1x8xf32, #tpu.memory_space<vmem>>, vector<1x1x8xf32>,
    %68 = arith.mulf %61, %61 : vector<64x8xf32>
    %cst_80 = arith.constant dense<0.000000e+00> : vector<8xf32>
    %69 = vector.multi_reduction <add>, %68, %cst_80 [0] : vector<64x8xf32> to vector<8xf32>
    %70 = vector.shape_cast %69 : vector<8xf32> to vector<1x8xf32>
    %c0_81 = arith.constant 0 : index
    %c0_82 = arith.constant 0 : index
    %c0_83 = arith.constant 0 : index
    %71 = vector.load %arg6[%c0_81, %c0_82, %c0_83] : memref<1x1x8xf32, #tpu.memory_space<vmem>>, vector<1x1x8xf32>
    %72 = vector.shape_cast %71 : vector<1x1x8xf32> to vector<1x8xf32>
    %73 = vector.shape_cast %70 : vector<1x8xf32> to vector<1x1x8xf32>
    tpu.vector_store %arg6[%c0_81, %c0_82, %c0_83], %73 {strides = array<i32>} : memref<1x1x8xf32, #tpu.memory_space<vmem>>, vector<1x1x8xf32>,
    return
  }
  func.func @transform_0(%arg0: i32) -> (i32, i32, i32, i32) {
    %c0_i32 = arith.constant 0 : i32
    %c0_i32_0 = arith.constant 0 : i32
    %c0_i32_1 = arith.constant 0 : i32
    %c0_i32_2 = arith.constant 0 : i32
    return %arg0, %c0_i32, %c0_i32_0, %c0_i32_1 : i32, i32, i32, i32
  }
  func.func @transform_1(%arg0: i32) -> (i32, i32) {
    %c0_i32 = arith.constant 0 : i32
    %c0_i32_0 = arith.constant 0 : i32
    %c0_i32_1 = arith.constant 0 : i32
    return %c0_i32, %c0_i32_0 : i32, i32
  }
  func.func @transform_2(%arg0: i32) -> (i32, i32) {
    %c0_i32 = arith.constant 0 : i32
    %c0_i32_0 = arith.constant 0 : i32
    %c0_i32_1 = arith.constant 0 : i32
    return %c0_i32, %c0_i32_0 : i32, i32
  }
  func.func @transform_3(%arg0: i32) -> (i32, i32) {
    %c0_i32 = arith.constant 0 : i32
    %c0_i32_0 = arith.constant 0 : i32
    return %arg0, %c0_i32 : i32, i32
  }
  func.func @transform_4(%arg0: i32) -> (i32, i32, i32) {
    %c0_i32 = arith.constant 0 : i32
    %c0_i32_0 = arith.constant 0 : i32
    %c0_i32_1 = arith.constant 0 : i32
    return %arg0, %c0_i32, %c0_i32_0 : i32, i32, i32
  }
  func.func @transform_5(%arg0: i32) -> (i32, i32, i32) {
    %c0_i32 = arith.constant 0 : i32
    %c0_i32_0 = arith.constant 0 : i32
    %c0_i32_1 = arith.constant 0 : i32
    return %arg0, %c0_i32, %c0_i32_0 : i32, i32, i32
  }
}

</mosaic_0001>

<bundles_post_ra>
// kernel: tpu_custom_call.1
= control target key start
LH: loop header
LB: loop body
LE: loop exit
PB: predicated region body
PF: predicated region fallthrough
CT: control target
= control target key end

     0   :  { %11 = vsyncpa [#allocation5], 0  ;;  %s1777_s0 = inlined_call_operand.vmem [shape: f32[2,16,8,8], index: 0, kind: input, shape index: {}]   ;;  %s1778_s1 = inlined_call_operand.vmem [shape: f32[36,8], index: 1, kind: input, shape index: {}]   ;;  %s1779_s2 = inlined_call_operand.vmem [shape: f32[1,8], index: 2, kind: input, shape index: {}]   ;;  %s1780_s3 = inlined_call_operand.vmem [shape: f32[128,8], index: 3, kind: output, shape index: {0}]   ;;  %s1781_s4 = inlined_call_operand.hbm [shape: f32[2,1,8], index: 4, kind: output, shape index: {1}]   ;;  %s1782_s5 = inlined_call_operand.hbm [shape: f32[2,1,8], index: 5, kind: output, shape index: {2}]  }
   0x1   :  { %13 = vsyncpa [#allocation5 + $0x1], 0 }
   0x2   :  { %14 = vsyncpa [#allocation7], 0 }
   0x3   :  { %16 = vsyncpa [#allocation7 + $0x1], 0  ;;  %s1382_s18 = smov 0   ;;  %s1384_s19 = smov 0  }
   0x4   :  { %s1386_s20 = smov 0   ;;  %s1388_s21 = smov 0  }
   0x5 LB: > { %s1403_s22 = sadd.s32 4294967295, %s1338_s21   ;;  %s1118_s23 = sadd.s32 4294967294, %s1338_s21   ;;  %s1338_s21 = sphi %s1388_s21, %s1788_s21   ;;  %s1334_s20 = sphi %s1386_s20, %s1787_s20   ;;  %s1330_s19 = sphi %s1384_s19, %s1786_s19   ;;  %s1326_s18 = sphi %s1382_s18, %s1785_s18  }
   0x6   : > { %s1407_s24 = sadd.s32 1, %s1338_s21   ;;  %s123_s25 = sadd.s32 1, %s1334_s20 }
   0x7   : > { %s120_s26 = ssub.s32 %s1338_s21, %s1407_s24  ;;  %p133_p0 = scmp.ne.s32.totalorder %s1334_s20, %s1330_s19 }
   0x8   : > { %p121_p1 = scmp.eq.s32.totalorder %s120_s26, 0  ;;  %p134_p2 = scmp.eq.s32.totalorder %s1403_s22, 1 }
   0x9   : > { %p139_p3 = scmp.ne.s32.totalorder %s1330_s19, %s1326_s18  ;;  %p140_p4 = scmp.eq.s32.totalorder %s1118_s23, 1 }
   0xa   : > { %s1418_s27 = scalar_select %p121_p1, %s1334_s20, %s123_s25  }
   0xb   : > { %p1420_p5 = por %p134_p2, %p133_p0  ;;  %p1424_p6 = por %p140_p4, %p139_p3 }
   0xc   : > { %p1121_p7 = scmp.ge.s32.totalorder %s1338_s21, 1  ;;  %p198_p8 = scmp.lt.s32.totalorder %s1338_s21, 3 }
   0xe   : > { %p199_p9 = pnand %p1121_p7, %p198_p8 }
   0xf   : > { %p234_p10 = scmp.lt.s32.totalorder (!%p199_p9), %s1403_s22, 1  ;;  %vm245_vm0 = vcmask (!%p199_p9), 31744   ;;  %vm247_vm1 = vcmask (!%p199_p9), 25600   ;;  %vm252_vm2 = vcmask (!%p199_p9), 24576   ;;  %v1340_v0 = vmov (!%p199_p9), 0.0   ;;  %s1341_s10 = smov (!%p199_p9), 124  }
  0x10   : > { %202 = sbr.rel (%p199_p9) target bundleno = 668 (0x29c), region = 32  ;;  %246 = vst.msk [vmem:[#allocation2] sm:$0xff] (!%p199_p9), %vm245_vm0, %v1340_v0  ;;  %250 = vst.msk [vmem:[#allocation2 + $0x90] sm:$0xff] (!%p199_p9), %vm245_vm0, %v1340_v0  ;;  %s1342_s11 = smov (!%p199_p9), 4   ;;  %vm402_vm3 = vcmask (!%p199_p9), 64544   ;;  %vm451_vm4 = vcmask (!%p199_p9), 97344  }
  0x11   : > { %248 = vst.msk [vmem:[#allocation2 + $0x8] sm:$0x3] (!%p199_p9), %vm247_vm1, %v1340_v0  ;;  %251 = vst.msk [vmem:[#allocation2 + $0x98] sm:$0x3] (!%p199_p9), %vm247_vm1, %v1340_v0  ;;  %s1343_s12 = smov (!%p199_p9), 24   ;;  %s1344_s13 = smov (!%p199_p9), 8  }
  0x12   : > { %254 = vst.msk [vmem:[#allocation2 + $0x10] sm:$0x1] (!%p199_p9), %vm252_vm2, %v1340_v0  ;;  %255 = vst.msk [vmem:[#allocation2 + $0x20] sm:$0x1] (!%p199_p9), %vm252_vm2, %v1340_v0  ;;  %s1345_s14 = smov (!%p199_p9), 12   ;;  %s1346_s15 = smov (!%p199_p9), 16  }
  0x13   : > { %256 = vst.msk [vmem:[#allocation2 + $0x30] sm:$0x1] (!%p199_p9), %vm252_vm2, %v1340_v0  ;;  %257 = vst.msk [vmem:[#allocation2 + $0x40] sm:$0x1] (!%p199_p9), %vm252_vm2, %v1340_v0  ;;  %s1347_s16 = smov (!%p199_p9), 20   ;;  %v763_v60 = vld [vmem:[%s1778_s1] sm:$0xff] (!%p199_p9) }
  0x14   : > { %258 = vst.msk [vmem:[#allocation2 + $0x50] sm:$0x1] (!%p199_p9), %vm252_vm2, %v1340_v0  ;;  %259 = vst.msk [vmem:[#allocation2 + $0x60] sm:$0x1] (!%p199_p9), %vm252_vm2, %v1340_v0  ;;  %v764_v61 = vld [vmem:[%s1778_s1 + $0x8] sm:$0xff] (!%p199_p9)  ;;  %v765_v63 = vld [vmem:[%s1778_s1 + $0x10] sm:$0xff] (!%p199_p9) }
  0x15   : > { %260 = vst.msk [vmem:[#allocation2 + $0x70] sm:$0x1] (!%p199_p9), %vm252_vm2, %v1340_v0  ;;  %261 = vst.msk [vmem:[#allocation2 + $0x80] sm:$0x1] (!%p199_p9), %vm252_vm2, %v1340_v0  ;;  %v1176_v62 = vpack.c.bf16 (!%p199_p9), %v764_v61, %v763_v60  ;;  %vm800_vm5 = vcmask (!%p199_p9), 1043456   ;;  %s1349_s23 = smov (!%p199_p9), 32  }
  0x16   : > { %264 = vst.msk [vmem:[#allocation2 + $0x19] sm:$0x1] (!%p199_p9), %vm252_vm2, %v1340_v0  ;;  %265 = vst.msk [vmem:[#allocation2 + $0x29] sm:$0x1] (!%p199_p9), %vm252_vm2, %v1340_v0  ;;  %vm500_vm6 = vcmask (!%p199_p9), 130144   ;;  %vm549_vm7 = vcmask (!%p199_p9), 162944  }
  0x17   : > { %266 = vst.msk [vmem:[#allocation2 + $0x39] sm:$0x1] %vm252_vm2, %v1340_v0  ;;  %267 = vst.msk [vmem:[#allocation2 + $0x49] sm:$0x1] %vm252_vm2, %v1340_v0  ;;  %s235_s30 = scalar_select %p234_p10, %s1403_s22, 1  ;;  %1177 = vmatprep.subr.bf16.mxu0 %v1176_v62  ;;  %1184 = vmatprep.subr.bf16.mxu1 %v1176_v62  ;;  %vm598_vm8 = vcmask 195744  }
  0x18   : > { %268 = vst.msk [vmem:[#allocation2 + $0x59] sm:$0x1] %vm252_vm2, %v1340_v0  ;;  %269 = vst.msk [vmem:[#allocation2 + $0x69] sm:$0x1] %vm252_vm2, %v1340_v0  ;;  %v362_v25 = vld [vmem:[#allocation2 + $0x1] sm:$0xff]  ;;  %1179 = vmatpush3.bf16.msra.mxu0 %v1176_v62  ;;  %1187 = vmatpush3.bf16.msra.mxu1 %v1176_v62  ;;  %vm648_vm9 = vcmask 228544  }
  0x19   : > { %270 = vst.msk [vmem:[#allocation2 + $0x79] sm:$0x1] %vm252_vm2, %v1340_v0  ;;  %271 = vst.msk [vmem:[#allocation2 + $0x89] sm:$0x1] %vm252_vm2, %v1340_v0  ;;  %s1140_s6 = sshll.u32 %s235_s30, 7  ;;  %s1348_s30 = smov 28  }
  0x1a   : > { %262 = vst.msk [vmem:[#allocation2 + $0x90] sm:$0x1] %vm252_vm2, %v1340_v0  ;;  %253 = vst.msk [vmem:[#allocation2] sm:$0x1] %vm252_vm2, %v1340_v0  ;;  %s238_s9 = scalar_lea.vmem %s1777_s0, %s1140_s6  ;;  %vm697_vm10 = vcmask 261344   ;;  %vm746_vm11 = vcmask 294144  }
  0x1b   : > { %263 = vst.msk [vmem:[#allocation2 + $0x9] sm:$0x1] %vm252_vm2, %v1340_v0  ;;  %272 = vst.msk [vmem:[#allocation2 + $0x99] sm:$0x1] %vm252_vm2, %v1340_v0  ;;  %v273_v1 = vld [vmem:[%s238_s9] sm:$0xff]  ;;  %v274_v2 = vld [vmem:[%s238_s9 + $0x8] sm:$0xff] }
  0x1c   : > { %v275_v3 = vld [vmem:[%s238_s9 + $0x10] sm:$0xff]  ;;  %v289_v4 = vmax.f32 %v273_v1, %v274_v2  ;;  %v276_v5 = vld [vmem:[%s238_s9 + $0x18] sm:$0xff]  ;;  %v277_v6 = vld [vmem:[%s238_s9 + $0x20] sm:$0xff]  ;;  %vm775_vm12 = vcmask 293888   ;;  %vm909_vm13 = vcmask 64512   ;;  %s1691_s26 = sand.u32 1, %s1330_s19  }
  0x1d   : > { %v278_v7 = vld [vmem:[%s238_s9 + $0x28] sm:$0xff]  ;;  %v279_v9 = vld [vmem:[%s238_s9 + $0x30] sm:$0xff]  ;;  %v280_v10 = vld [vmem:[%s238_s9 + $0x38] sm:$0xff]  ;;  %v290_v11 = vmax.f32 %v275_v3, %v276_v5  ;;  %s227_s6 = scalar_lea.vmem [#allocation4], %s1691_s26  ;;  %vm939_vm14 = vcmask 57344   ;;  %s233_s8 = scalar_lea.vmem [#allocation6], %s1691_s26 }
  0x1e   : > { %v291_v8 = vmax.f32 %v277_v6, %v278_v7  ;;  %305 = vrot.lane.b32.xlu0 %v289_v4, %s1341_s10  ;;  %v292_v12 = vmax.f32 %v279_v9, %v280_v10  ;;  %v281_v13 = vld [vmem:[%s238_s9 + $0x40] sm:$0xff]  ;;  %v282_v14 = vld [vmem:[%s238_s9 + $0x48] sm:$0xff]  ;;  %v283_v15 = vld [vmem:[%s238_s9 + $0x50] sm:$0xff]  ;;  %s997_s7 = sshll.u32 %s227_s6, 4  ;;  %s1703_s7 = int_to_ptr.vmem [resolvable:$true] %s997_s7 }
  0x1f   : > { %v284_v16 = vld [vmem:[%s238_s9 + $0x58] sm:$0xff]  ;;  %v293_v17 = vmax.f32 %v281_v13, %v282_v14  ;;  %v285_v19 = vld [vmem:[%s238_s9 + $0x60] sm:$0xff]  ;;  %v286_v20 = vld [vmem:[%s238_s9 + $0x68] sm:$0xff] }
  0x20   : > { %309 = vrot.lane.b32.xlu1 %v291_v8, %s1341_s10  ;;  %v294_v18 = vmax.f32 %v283_v15, %v284_v16  ;;  %v287_v21 = vld [vmem:[%s238_s9 + $0x70] sm:$0xff]  ;;  %v288_v22 = vld [vmem:[%s238_s9 + $0x78] sm:$0xff]  ;;  %v295_v23 = vmax.f32 %v285_v19, %v286_v20  ;;  %v767_v3 = vld [vmem:[%s1778_s1 + $0x20] sm:$0xf]  ;;  %s1010_s9 = sshll.u32 %s233_s8, 4  ;;  %s1711_s9 = int_to_ptr.vmem [resolvable:$true] %s1010_s9 }
  0x21   : > { %v296_v24 = vmax.f32 %v287_v21, %v288_v22  ;;  %v615_v26 = vld [vmem:[#allocation2 + $0x90] sm:$0xff]  ;;  %v346_v28 = vld [vmem:[#allocation2] sm:$0xff]  ;;  %v766_v0 = vld [vmem:[%s1778_s1 + $0x18] sm:$0xff] }
  0x22   : > { %307 = vrot.lane.b32.xlu0 %v290_v11, %s1341_s10  ;;  %v411_v27 = vld [vmem:[#allocation2 + $0x2] sm:$0xff]  ;;  %354 = vst.msk [vmem:[#allocation3] sm:$0xff] %vm245_vm0, %v346_v28  ;;  %v1180_v2 = vpack.c.bf16 %v766_v0, %v765_v63  ;;  %v664_v15 = vld [vmem:[#allocation2 + $0x91] sm:$0xff] }
  0x24   : > { %311 = vrot.lane.b32.xlu1 %v292_v12, %s1341_s10  ;;  %1181 = vmatprep.subr.bf16.mxu0 %v1180_v2 }
  0x25   : > { %1185 = vmatprep.subr.bf16.mxu1 %v1180_v2  ;;  %1183 = vmatpush3.bf16.msra.mxu0 %v1180_v2 }
  0x26   : > { %313 = vrot.lane.b32.xlu0 %v293_v17, %s1341_s10  ;;  %1188 = vmatpush3.bf16.msra.mxu1 %v1180_v2 }
  0x27   : > { %1162 = vmatprep.subr.msk.mxu0 %vm800_vm5, %v767_v3  ;;  %1186 = vmatprep.subr.msk.mxu1 %vm800_vm5, %v767_v3 }
  0x28   : > { %315 = vrot.lane.b32.xlu1 %v294_v18, %s1341_s10 }
  0x29   : > { %1163 = vmatpush3.msk.msra.mxu0 %vm800_vm5, %v767_v3 }
  0x2a   : > { %317 = vrot.lane.b32.xlu0 %v295_v23, %s1341_s10  ;;  %1189 = vmatpush3.msk.msra.mxu1 %vm800_vm5, %v767_v3 }
  0x2c   : > { %319 = vrot.lane.b32.xlu1 %v296_v24, %s1341_s10 }
  0x2e   : > { %378 = vrot.lane.b32.xlu0 %v362_v25, %s1342_s11 }
  0x30   : > { %638 = vrot.lane.b32.xlu1 %v615_v26, %s1343_s12 }
  0x32   : > { %427 = vrot.lane.b32.xlu0 %v411_v27, %s1344_s13 }
  0x90   : > { %v306_v29 = vpop.permute.xlu0 %305 }
  0x91   : > { %v329_v30 = vmax.f32 %v289_v4, %v306_v29 }
  0x92   : > { %v310_v31 = vpop.permute.xlu1 %309 }
  0x93   : > { %v331_v32 = vmax.f32 %v291_v8, %v310_v31  ;;  %338 = vst.msk [vmem:[#allocation2 + $0x11] sm:$0xff] %vm245_vm0, %v329_v30 }
  0x94   : > { %v308_v33 = vpop.permute.xlu0 %307 }
  0x95   : > { %340 = vst.msk [vmem:[#allocation2 + $0x31] sm:$0xff] %vm245_vm0, %v331_v32  ;;  %v330_v34 = vmax.f32 %v290_v11, %v308_v33 }
  0x96   : > { %v312_v35 = vpop.permute.xlu1 %311 }
  0x97   : > { %v332_v36 = vmax.f32 %v292_v12, %v312_v35  ;;  %339 = vst.msk [vmem:[#allocation2 + $0x21] sm:$0xff] %vm245_vm0, %v330_v34 }
  0x98   : > { %v314_v37 = vpop.permute.xlu0 %313 }
  0x99   : > { %341 = vst.msk [vmem:[#allocation2 + $0x41] sm:$0xff] %vm245_vm0, %v332_v36  ;;  %v333_v38 = vmax.f32 %v293_v17, %v314_v37 }
  0x9a   : > { %v316_v39 = vpop.permute.xlu1 %315  ;;  %v460_v40 = vld [vmem:[#allocation2 + $0x10] sm:$0xff] }
  0x9b   : > { %v363_v41 = vld [vmem:[#allocation2 + $0x11] sm:$0xff]  ;;  %v334_v42 = vmax.f32 %v294_v18, %v316_v39  ;;  %476 = vrot.lane.b32.xlu0 %v460_v40, %s1345_s14  ;;  %342 = vst.msk [vmem:[#allocation2 + $0x51] sm:$0xff] %vm245_vm0, %v333_v38  ;;  %355 = vst.msk [vmem:[#allocation3 + $0x8] sm:$0xff] %vm245_vm0, %v460_v40 }
  0x9c   : > { %380 = vrot.lane.b32.xlu1 %v363_v41, %s1342_s11  ;;  %v609_v43 = vld [vmem:[#allocation2 + $0x30] sm:$0xff]  ;;  %v318_v44 = vpop.permute.xlu0 %317 }
  0x9d   : > { %343 = vst.msk [vmem:[#allocation2 + $0x61] sm:$0xff] %vm245_vm0, %v334_v42  ;;  %357 = vst.msk [vmem:[#allocation3 + $0x18] sm:$0xff] %vm245_vm0, %v609_v43  ;;  %v335_v45 = vmax.f32 %v295_v23, %v318_v44  ;;  %v412_v47 = vld [vmem:[#allocation2 + $0x12] sm:$0xff] }
  0x9e   : > { %v320_v46 = vpop.permute.xlu1 %319  ;;  %v461_v48 = vld [vmem:[#allocation2 + $0x20] sm:$0xff]  ;;  %v365_v55 = vld [vmem:[#allocation2 + $0x31] sm:$0xff] }
  0x9f   : > { %v336_v49 = vmax.f32 %v296_v24, %v320_v46  ;;  %525 = vrot.lane.b32.xlu0 %v363_v41, %s1346_s15  ;;  %344 = vst.msk [vmem:[#allocation2 + $0x71] sm:$0xff] %vm245_vm0, %v335_v45  ;;  %356 = vst.msk [vmem:[#allocation3 + $0x10] sm:$0xff] %vm245_vm0, %v461_v48  ;;  %v510_v51 = vld [vmem:[#allocation2 + $0x21] sm:$0xff]  ;;  %v414_v59 = vld [vmem:[#allocation2 + $0x32] sm:$0xff] }
  0xa0   : > { %429 = vrot.lane.b32.xlu1 %v412_v47, %s1344_s13  ;;  %v1475_v50 = vld [vmem:[#allocation2 + $0x40] sm:$0xff]  ;;  %v379_v52 = vpop.permute.xlu0 %378  ;;  %v713_v18 = vld [vmem:[#allocation2 + $0x92] sm:$0xff] }
  0xa1   : > { %345 = vst.msk [vmem:[#allocation2 + $0x81] sm:$0xff] %vm245_vm0, %v336_v49  ;;  %358 = vst.msk [vmem:[#allocation3 + $0x20] sm:$0xff] %vm245_vm0, %v1475_v50  ;;  %v559_v58 = vld [vmem:[#allocation2 + $0x22] sm:$0xff] }
  0xa2   : > { %403 = vst.msk [vmem:[#allocation3] sm:$0xff] %vm402_vm3, %v379_v52  ;;  %v1483_v53 = vld [vmem:[#allocation2 + $0x50] sm:$0xff]  ;;  %v366_v1 = vld [vmem:[#allocation2 + $0x41] sm:$0xff]  ;;  %v1571_v13 = vpop.permute.xlu1 %638 }
  0xa3   : > { %527 = vrot.lane.b32.xlu0 %v510_v51, %s1346_s15  ;;  %359 = vst.msk [vmem:[#allocation3 + $0x28] sm:$0xff] %vm245_vm0, %v1483_v53  ;;  %v367_v4 = vld [vmem:[#allocation2 + $0x51] sm:$0xff]  ;;  %v561_v5 = vld [vmem:[#allocation2 + $0x42] sm:$0xff] }
  0xa4   : > { %478 = vrot.lane.b32.xlu1 %v461_v48, %s1345_s14  ;;  %v1487_v54 = vld [vmem:[#allocation2 + $0x60] sm:$0xff]  ;;  %v428_v56 = vpop.permute.xlu0 %427  ;;  %v416_v6 = vld [vmem:[#allocation2 + $0x52] sm:$0xff] }
  0xa5   : > { %360 = vst.msk [vmem:[#allocation3 + $0x30] sm:$0xff] %vm245_vm0, %v1487_v54  ;;  %v368_v7 = vld [vmem:[#allocation2 + $0x61] sm:$0xff] }
  0xa6   : > { %452 = vst.msk [vmem:[#allocation3] sm:$0xff] %vm451_vm4, %v428_v56  ;;  %v1494_v57 = vld [vmem:[#allocation2 + $0x70] sm:$0xff]  ;;  %v563_v9 = vld [vmem:[#allocation2 + $0x62] sm:$0xff] }
  0xa7   : > { %384 = vrot.lane.b32.xlu0 %v365_v55, %s1342_s11  ;;  %361 = vst.msk [vmem:[#allocation3 + $0x38] sm:$0xff] %vm245_vm0, %v1494_v57  ;;  %v369_v8 = vld [vmem:[#allocation2 + $0x71] sm:$0xff] }
  0xa8   : > { %382 = vrot.lane.b32.xlu1 %v510_v51, %s1342_s11  ;;  %v418_v10 = vld [vmem:[#allocation2 + $0x72] sm:$0xff]  ;;  %v467_v11 = vld [vmem:[#allocation2 + $0x80] sm:$0xff] }
  0xa9   : > { %v516_v12 = vld [vmem:[#allocation2 + $0x81] sm:$0xff] }
  0xaa   : > { %v565_v14 = vld [vmem:[#allocation2 + $0x82] sm:$0xff] }
  0xab   : > { %576 = vrot.lane.b32.xlu0 %v559_v58, %s1347_s16 }
  0xac   : > { %574 = vrot.lane.b32.xlu1 %v412_v47, %s1347_s16 }
  0xaf   : > { %433 = vrot.lane.b32.xlu0 %v414_v59, %s1344_s13 }
  0xb0   : > { %431 = vrot.lane.b32.xlu1 %v559_v58, %s1344_s13 }
  0xb3   : > { %626 = vrot.lane.b32.xlu0 %v609_v43, %s1343_s12 }
  0xb4   : > { %624 = vrot.lane.b32.xlu1 %v461_v48, %s1343_s12 }
  0xb7   : > { %482 = vrot.lane.b32.xlu0 %v1475_v50, %s1345_s14 }
  0xb8   : > { %480 = vrot.lane.b32.xlu1 %v609_v43, %s1345_s14 }
  0xbb   : > { %675 = vrot.lane.b32.xlu0 %v365_v55, %s1348_s30 }
  0xbc   : > { %673 = vrot.lane.b32.xlu1 %v510_v51, %s1348_s30 }
  0xbf   : > { %386 = vrot.lane.b32.xlu0 %v366_v1, %s1342_s11 }
  0xc0   : > { %529 = vrot.lane.b32.xlu1 %v365_v55, %s1346_s15 }
  0xc3   : > { %578 = vrot.lane.b32.xlu0 %v414_v59, %s1347_s16 }
  0xc4   : > { %722 = vrot.lane.b32.xlu1 %v559_v58, %s1349_s23 }
  0xc7   : > { %388 = vrot.lane.b32.xlu0 %v367_v4, %s1342_s11 }
  0xc8   : > { %531 = vrot.lane.b32.xlu1 %v366_v1, %s1346_s15 }
  0xcb   : > { %580 = vrot.lane.b32.xlu0 %v561_v5, %s1347_s16 }
  0xcc   : > { %724 = vrot.lane.b32.xlu1 %v414_v59, %s1349_s23 }
  0xcf   : > { %437 = vrot.lane.b32.xlu0 %v416_v6, %s1344_s13 }
  0xd0   : > { %435 = vrot.lane.b32.xlu1 %v561_v5, %s1344_s13 }
  0xd3   : > { %630 = vrot.lane.b32.xlu0 %v1483_v53, %s1343_s12 }
  0xd4   : > { %628 = vrot.lane.b32.xlu1 %v1475_v50, %s1343_s12 }
  0xd7   : > { %486 = vrot.lane.b32.xlu0 %v1487_v54, %s1345_s14 }
  0xd8   : > { %484 = vrot.lane.b32.xlu1 %v1483_v53, %s1345_s14 }
  0xdb   : > { %679 = vrot.lane.b32.xlu0 %v367_v4, %s1348_s30 }
  0xdc   : > { %677 = vrot.lane.b32.xlu1 %v366_v1, %s1348_s30 }
  0xdf   : > { %390 = vrot.lane.b32.xlu0 %v368_v7, %s1342_s11 }
  0xe0   : > { %533 = vrot.lane.b32.xlu1 %v367_v4, %s1346_s15 }
  0xe3   : > { %582 = vrot.lane.b32.xlu0 %v416_v6, %s1347_s16 }
  0xe4   : > { %726 = vrot.lane.b32.xlu1 %v561_v5, %s1349_s23 }
  0xe7   : > { %392 = vrot.lane.b32.xlu0 %v369_v8, %s1342_s11  ;;  %s1124_s11 = sshll.u32 %s1403_s22, 3 }
  0xe8   : > { %535 = vrot.lane.b32.xlu1 %v368_v7, %s1346_s15  ;;  %p240_p11 = scmp.lt.s32.totalorder %s1124_s11, 15 }
  0xea   : > { %s1790_s11 = smov (!%p240_p11, %s1124_s11), 15 }
  0xeb   : > { %584 = vrot.lane.b32.xlu0 %v563_v9, %s1347_s16 }
  0xec   : > { %728 = vrot.lane.b32.xlu1 %v416_v6, %s1349_s23 }
  0xef   : > { %441 = vrot.lane.b32.xlu0 %v418_v10, %s1344_s13 }
  0xf0   : > { %439 = vrot.lane.b32.xlu1 %v563_v9, %s1344_s13  ;;  %s977_s13 = scalar_lea.sflag [#allocation5], %s1691_s26 }
  0xf3   : > { %634 = vrot.lane.b32.xlu0 %v1494_v57, %s1343_s12 }
  0xf4   : > { %632 = vrot.lane.b32.xlu1 %v1487_v54, %s1343_s12 }
  0xf7   : > { %490 = vrot.lane.b32.xlu0 %v467_v11, %s1345_s14 }
  0xf8   : > { %488 = vrot.lane.b32.xlu1 %v1494_v57, %s1345_s14  ;;  %s1244_s14 = scalar_lea.vmem %s1703_s7, 16 }
  0xf9   : > { %p1245_p12 = scmp.ne.s32.totalorder %s1703_s7, %s1244_s14 }
  0xfb   : > { %683 = vrot.lane.b32.xlu0 %v369_v8, %s1348_s30  ;;  %p1246_p13 = pnand %p1245_p12, %p1420_p5 }
  0xfc   : > { %681 = vrot.lane.b32.xlu1 %v368_v7, %s1348_s30 }
  0xfd   : > { %p1247_p0 = pneg %p1246_p13 }
  0xff   : > { %539 = vrot.lane.b32.xlu0 %v516_v12, %s1346_s15 }
 0x100   : > { %537 = vrot.lane.b32.xlu1 %v369_v8, %s1346_s15  ;;  %s1350_s15 = smov [#allocation4]  }
 0x103   : > { %732 = vrot.lane.b32.xlu0 %v418_v10, %s1349_s23 }
 0x104   : > { %730 = vrot.lane.b32.xlu1 %v563_v9, %s1349_s23 }
 0x107   : > { %636 = vrot.lane.b32.xlu0 %v467_v11, %s1343_s12  ;;  %s1125_s12 = sshll.u32 %s1790_s11, 3 }
 0x108   : > { %586 = vrot.lane.b32.xlu1 %v418_v10, %s1347_s16  ;;  %s1656_s25 = scalar_lea.vmem %s1780_s3, %s1125_s12 }
 0x10b   : > { %685 = vrot.lane.b32.xlu0 %v516_v12, %s1348_s30 }
 0x10c   : > { %588 = vrot.lane.b32.xlu1 %v565_v14, %s1347_s16  ;;  %s1248_s16 = sshll.u32 %s1350_s15, 4  ;;  %s1249_s16 = int_to_ptr.vmem [resolvable:$false] %s1248_s16 }
 0x10d   : > { %v477_v17 = vpop.permute.xlu0 %476  ;;  %p1251_p1 = scmp.lt.s32.totalorder %s1703_s7, %s1249_s16 }
 0x10e   : > { %v381_v16 = vpop.permute.xlu1 %380  ;;  %501 = vst.msk [vmem:[#allocation3] sm:$0xff] %vm500_vm6, %v477_v17 }
 0x10f   : > { %404 = vst.msk [vmem:[#allocation3 + $0x8] sm:$0xff] %vm402_vm3, %v381_v16  ;;  %734 = vrot.lane.b32.xlu0 %v565_v14, %s1349_s23 }
 0x110   : > { %687 = vrot.lane.b32.xlu1 %v664_v15, %s1348_s30  ;;  %s1136_s30 = sshll.u32 %s1403_s22, 4 }
 0x111   : > { %v526_v20 = vpop.permute.xlu0 %525  ;;  %s1709_s12 = scalar_lea.hbm %s1782_s5, %s1136_s30 }
 0x112   : > { %v430_v19 = vpop.permute.xlu1 %429  ;;  %550 = vst.msk [vmem:[#allocation3] sm:$0xff] %vm549_vm7, %v526_v20 }
 0x113   : > { %453 = vst.msk [vmem:[#allocation3 + $0x8] sm:$0xff] %vm451_vm4, %v430_v19 }
 0x114   : > { %736 = vrot.lane.b32.xlu1 %v713_v18, %s1349_s23  ;;  %s1701_s23 = scalar_lea.hbm %s1781_s4, %s1136_s30 }
 0x115   : > { %v528_v22 = vpop.permute.xlu0 %527 }
 0x116   : > { %v479_v21 = vpop.permute.xlu1 %478 }
 0x117   : > { %502 = vst.msk [vmem:[#allocation3 + $0x8] sm:$0xff] %vm500_vm6, %v479_v21 }
 0x118   : > { %551 = vst.msk [vmem:[#allocation3 + $0x8] sm:$0xff] %vm549_vm7, %v528_v22 }
 0x119   : > { %v385_v24 = vpop.permute.xlu0 %384 }
 0x11a   : > { %v383_v23 = vpop.permute.xlu1 %382  ;;  %406 = vst.msk [vmem:[#allocation3 + $0x18] sm:$0xff] %vm402_vm3, %v385_v24 }
 0x11b   : > { %405 = vst.msk [vmem:[#allocation3 + $0x10] sm:$0xff] %vm402_vm3, %v383_v23 }
 0x11d   : > { %v577_v26 = vpop.permute.xlu0 %576 }
 0x11e   : > { %v575_v25 = vpop.permute.xlu1 %574  ;;  %600 = vst.msk [vmem:[#allocation3 + $0x8] sm:$0xff] %vm598_vm8, %v577_v26 }
 0x11f   : > { %599 = vst.msk [vmem:[#allocation3] sm:$0xff] %vm598_vm8, %v575_v25 }
 0x121   : > { %v434_v28 = vpop.permute.xlu0 %433 }
 0x122   : > { %v432_v27 = vpop.permute.xlu1 %431  ;;  %455 = vst.msk [vmem:[#allocation3 + $0x18] sm:$0xff] %vm451_vm4, %v434_v28 }
 0x123   : > { %454 = vst.msk [vmem:[#allocation3 + $0x10] sm:$0xff] %vm451_vm4, %v432_v27 }
 0x125   : > { %v627_v30 = vpop.permute.xlu0 %626 }
 0x126   : > { %v625_v29 = vpop.permute.xlu1 %624  ;;  %650 = vst.msk [vmem:[#allocation3 + $0x8] sm:$0xff] %vm648_vm9, %v627_v30 }
 0x127   : > { %649 = vst.msk [vmem:[#allocation3] sm:$0xff] %vm648_vm9, %v625_v29 }
 0x129   : > { %v483_v32 = vpop.permute.xlu0 %482 }
 0x12a   : > { %v481_v31 = vpop.permute.xlu1 %480  ;;  %504 = vst.msk [vmem:[#allocation3 + $0x18] sm:$0xff] %vm500_vm6, %v483_v32 }
 0x12b   : > { %503 = vst.msk [vmem:[#allocation3 + $0x10] sm:$0xff] %vm500_vm6, %v481_v31 }
 0x12d   : > { %v676_v34 = vpop.permute.xlu0 %675 }
 0x12e   : > { %v674_v33 = vpop.permute.xlu1 %673  ;;  %699 = vst.msk [vmem:[#allocation3 + $0x8] sm:$0xff] %vm697_vm10, %v676_v34 }
 0x12f   : > { %698 = vst.msk [vmem:[#allocation3] sm:$0xff] %vm697_vm10, %v674_v33 }
 0x131   : > { %v387_v36 = vpop.permute.xlu0 %386 }
 0x132   : > { %v530_v35 = vpop.permute.xlu1 %529  ;;  %407 = vst.msk [vmem:[#allocation3 + $0x20] sm:$0xff] %vm402_vm3, %v387_v36 }
 0x133   : > { %552 = vst.msk [vmem:[#allocation3 + $0x10] sm:$0xff] %vm549_vm7, %v530_v35 }
 0x135   : > { %v579_v38 = vpop.permute.xlu0 %578 }
 0x136   : > { %v723_v37 = vpop.permute.xlu1 %722  ;;  %601 = vst.msk [vmem:[#allocation3 + $0x10] sm:$0xff] %vm598_vm8, %v579_v38 }
 0x137   : > { %747 = vst.msk [vmem:[#allocation3] sm:$0xff] %vm746_vm11, %v723_v37 }
 0x139   : > { %v389_v40 = vpop.permute.xlu0 %388 }
 0x13a   : > { %v532_v39 = vpop.permute.xlu1 %531  ;;  %408 = vst.msk [vmem:[#allocation3 + $0x28] sm:$0xff] %vm402_vm3, %v389_v40 }
 0x13b   : > { %553 = vst.msk [vmem:[#allocation3 + $0x18] sm:$0xff] %vm549_vm7, %v532_v39 }
 0x13d   : > { %v581_v42 = vpop.permute.xlu0 %580 }
 0x13e   : > { %v725_v41 = vpop.permute.xlu1 %724  ;;  %v755_v43 = vld [vmem:[#allocation3] sm:$0xff]  ;;  %602 = vst.msk [vmem:[#allocation3 + $0x18] sm:$0xff] %vm598_vm8, %v581_v42 }
 0x13f   : > { %748 = vst.msk [vmem:[#allocation3 + $0x8] sm:$0xff] %vm746_vm11, %v725_v41  ;;  %1164 = vmatprep.mubr.msk.f32.mxu0 %vm775_vm12, %v755_v43 }
 0x141   : > { %v438_v45 = vpop.permute.xlu0 %437 }
 0x142   : > { %v436_v44 = vpop.permute.xlu1 %435  ;;  %457 = vst.msk [vmem:[#allocation3 + $0x28] sm:$0xff] %vm451_vm4, %v438_v45 }
 0x143   : > { %456 = vst.msk [vmem:[#allocation3 + $0x20] sm:$0xff] %vm451_vm4, %v436_v44 }
 0x145   : > { %v631_v47 = vpop.permute.xlu0 %630 }
 0x146   : > { %v629_v46 = vpop.permute.xlu1 %628  ;;  %v756_v48 = vld [vmem:[#allocation3 + $0x8] sm:$0xff]  ;;  %652 = vst.msk [vmem:[#allocation3 + $0x18] sm:$0xff] %vm648_vm9, %v631_v47 }
 0x147   : > { %651 = vst.msk [vmem:[#allocation3 + $0x10] sm:$0xff] %vm648_vm9, %v629_v46  ;;  %1165 = vmatmul.mubr.msk.f32.vlgmr.msra.gmra.mrb[0].mxu0 %vm775_vm12, %v756_v48 }
 0x149   : > { %v487_v50 = vpop.permute.xlu0 %486 }
 0x14a   : > { %v485_v49 = vpop.permute.xlu1 %484  ;;  %506 = vst.msk [vmem:[#allocation3 + $0x28] sm:$0xff] %vm500_vm6, %v487_v50 }
 0x14b   : > { %505 = vst.msk [vmem:[#allocation3 + $0x20] sm:$0xff] %vm500_vm6, %v485_v49 }
 0x14d   : > { %v680_v52 = vpop.permute.xlu0 %679 }
 0x14e   : > { %v678_v51 = vpop.permute.xlu1 %677  ;;  %701 = vst.msk [vmem:[#allocation3 + $0x18] sm:$0xff] %vm697_vm10, %v680_v52 }
 0x14f   : > { %700 = vst.msk [vmem:[#allocation3 + $0x10] sm:$0xff] %vm697_vm10, %v678_v51 }
 0x151   : > { %v391_v54 = vpop.permute.xlu0 %390 }
 0x152   : > { %v534_v53 = vpop.permute.xlu1 %533  ;;  %409 = vst.msk [vmem:[#allocation3 + $0x30] sm:$0xff] %vm402_vm3, %v391_v54 }
 0x153   : > { %554 = vst.msk [vmem:[#allocation3 + $0x20] sm:$0xff] %vm549_vm7, %v534_v53 }
 0x155   : > { %v583_v56 = vpop.permute.xlu0 %582 }
 0x156   : > { %v727_v55 = vpop.permute.xlu1 %726  ;;  %603 = vst.msk [vmem:[#allocation3 + $0x20] sm:$0xff] %vm598_vm8, %v583_v56 }
 0x157   : > { %749 = vst.msk [vmem:[#allocation3 + $0x10] sm:$0xff] %vm746_vm11, %v727_v55 }
 0x159   : > { %v393_v58 = vpop.permute.xlu0 %392 }
 0x15a   : > { %v536_v57 = vpop.permute.xlu1 %535  ;;  %410 = vst.msk [vmem:[#allocation3 + $0x38] sm:$0xff] %vm402_vm3, %v393_v58 }
 0x15b   : > { %555 = vst.msk [vmem:[#allocation3 + $0x28] sm:$0xff] %vm549_vm7, %v536_v57 }
 0x15d   : > { %v585_v60 = vpop.permute.xlu0 %584 }
 0x15e   : > { %v729_v59 = vpop.permute.xlu1 %728  ;;  %v757_v61 = vld [vmem:[#allocation3 + $0x10] sm:$0xff]  ;;  %604 = vst.msk [vmem:[#allocation3 + $0x28] sm:$0xff] %vm598_vm8, %v585_v60 }
 0x15f   : > { %750 = vst.msk [vmem:[#allocation3 + $0x18] sm:$0xff] %vm746_vm11, %v729_v59  ;;  %1167 = vmatprep.mubr.msk.f32.mxu0 %vm775_vm12, %v757_v61 }
 0x161   : > { %v442_v63 = vpop.permute.xlu0 %441 }
 0x162   : > { %v440_v62 = vpop.permute.xlu1 %439  ;;  %459 = vst.msk [vmem:[#allocation3 + $0x38] sm:$0xff] %vm451_vm4, %v442_v63 }
 0x163   : > { %458 = vst.msk [vmem:[#allocation3 + $0x30] sm:$0xff] %vm451_vm4, %v440_v62 }
 0x165   : > { %v635_v1 = vpop.permute.xlu0 %634 }
 0x166   : > { %v633_v0 = vpop.permute.xlu1 %632  ;;  %v758_v2 = vld [vmem:[#allocation3 + $0x18] sm:$0xff]  ;;  %654 = vst.msk [vmem:[#allocation3 + $0x28] sm:$0xff] %vm648_vm9, %v635_v1 }
 0x167   : > { %653 = vst.msk [vmem:[#allocation3 + $0x20] sm:$0xff] %vm648_vm9, %v633_v0  ;;  %1168 = vmatmul.mubr.msk.f32.gmra.mrb[2].mxu0 %vm775_vm12, %v758_v2 }
 0x169   : > { %v491_v4 = vpop.permute.xlu0 %490 }
 0x16a   : > { %v489_v3 = vpop.permute.xlu1 %488  ;;  %508 = vst.msk [vmem:[#allocation3 + $0x38] sm:$0xff] %vm500_vm6, %v491_v4 }
 0x16b   : > { %507 = vst.msk [vmem:[#allocation3 + $0x30] sm:$0xff] %vm500_vm6, %v489_v3 }
 0x16d   : > { %v684_v6 = vpop.permute.xlu0 %683 }
 0x16e   : > { %v682_v5 = vpop.permute.xlu1 %681  ;;  %703 = vst.msk [vmem:[#allocation3 + $0x28] sm:$0xff] %vm697_vm10, %v684_v6 }
 0x16f   : > { %702 = vst.msk [vmem:[#allocation3 + $0x20] sm:$0xff] %vm697_vm10, %v682_v5 }
 0x171   : > { %v540_v8 = vpop.permute.xlu0 %539 }
 0x172   : > { %v538_v7 = vpop.permute.xlu1 %537  ;;  %557 = vst.msk [vmem:[#allocation3 + $0x38] sm:$0xff] %vm549_vm7, %v540_v8 }
 0x173   : > { %556 = vst.msk [vmem:[#allocation3 + $0x30] sm:$0xff] %vm549_vm7, %v538_v7 }
 0x175   : > { %v733_v10 = vpop.permute.xlu0 %732 }
 0x176   : > { %v731_v9 = vpop.permute.xlu1 %730  ;;  %752 = vst.msk [vmem:[#allocation3 + $0x28] sm:$0xff] %vm746_vm11, %v733_v10 }
 0x177   : > { %751 = vst.msk [vmem:[#allocation3 + $0x20] sm:$0xff] %vm746_vm11, %v731_v9 }
 0x179   : > { %v637_v12 = vpop.permute.xlu0 %636 }
 0x17a   : > { %v587_v11 = vpop.permute.xlu1 %586 }
 0x17b   : > { %605 = vst.msk [vmem:[#allocation3 + $0x30] sm:$0xff] %vm598_vm8, %v587_v11 }
 0x17c   : > { %655 = vst.msk [vmem:[#allocation3 + $0x30] sm:$0xff] %vm648_vm9, %v637_v12 }
 0x17d   : > { %v686_v15 = vpop.permute.xlu0 %685  ;;  %v760_v17 = vld [vmem:[#allocation3 + $0x28] sm:$0xff] }
 0x17e   : > { %v589_v14 = vpop.permute.xlu1 %588  ;;  %v759_v16 = vld [vmem:[#allocation3 + $0x20] sm:$0xff]  ;;  %704 = vst.msk [vmem:[#allocation3 + $0x30] sm:$0xff] %vm697_vm10, %v686_v15 }
 0x17f   : > { %606 = vst.msk [vmem:[#allocation3 + $0x38] sm:$0xff] %vm598_vm8, %v589_v14  ;;  %1170 = vmatprep.mubr.msk.f32.mxu1 %vm775_vm12, %v759_v16 }
 0x180   : > { %656 = vst.msk [vmem:[#allocation3 + $0x38] sm:$0xff] %vm648_vm9, %v1571_v13  ;;  %1171 = vmatmul.mubr.msk.f32.vlgmr.msra.gmra.mrb[0].mxu1 %vm775_vm12, %v760_v17  ;;  %v1126_v13 = vld [vmem:[%s1779_s2] ss:$0 sm:$0xff] }
 0x181   : > { %v735_v19 = vpop.permute.xlu0 %734 }
 0x182   : > { %v688_v18 = vpop.permute.xlu1 %687  ;;  %753 = vst.msk [vmem:[#allocation3 + $0x30] sm:$0xff] %vm746_vm11, %v735_v19 }
 0x183   : > { %705 = vst.msk [vmem:[#allocation3 + $0x38] sm:$0xff] %vm697_vm10, %v688_v18 }
 0x186   : > { %v737_v20 = vpop.permute.xlu1 %736 }
 0x187   : > { %754 = vst.msk [vmem:[#allocation3 + $0x38] sm:$0xff] %vm746_vm11, %v737_v20 }
 0x189   : > { %v761_v21 = vld [vmem:[#allocation3 + $0x30] sm:$0xff] }
 0x18a   : > { %1173 = vmatprep.mubr.msk.f32.mxu1 %vm775_vm12, %v761_v21 }
 0x18e   : > { %v762_v22 = vld [vmem:[#allocation3 + $0x38] sm:$0xff] }
 0x18f   : > { %1174 = vmatmul.mubr.msk.f32.gmra.mrb[2].mxu1 %vm775_vm12, %v762_v22 }
 0x21a   : > { %v1166_v23 = vpop.f32.mrb[0].mxu0 }
 0x21b   : > { %v876_v24 = vadd.f32 %v1166_v23, %v1126_v13  ;;  %v870_v25 = vpop.f32.mrb[1].mxu0 }
 0x21c   : > { %v871_v26 = vadd.f32 %v1126_v13, %v870_v25 }
 0x21d   : > { %911 = vst.msk [vmem:[%s1656_s25 + $0x8] sm:$0xff] %vm909_vm13, %v876_v24  ;;  %v919_v27 = vsel %vm909_vm13, %v876_v24, 0.0  ;;  %v942_v28 = vmul.f32 %v876_v24, %v876_v24 }
 0x21e   : > { %910 = vst.msk [vmem:[%s1656_s25] sm:$0xff] %vm909_vm13, %v871_v26  ;;  %v918_v29 = vsel %vm909_vm13, %v871_v26, 0.0  ;;  %v941_v30 = vmul.f32 %v871_v26, %v871_v26 }
 0x21f   : > { %v950_v31 = vsel %vm909_vm13, %v942_v28, 0.0  ;;  %v920_v32 = vadd.f32 %v919_v27, %v918_v29 }
 0x220   : > { %v949_v33 = vsel %vm909_vm13, %v941_v30, 0.0 }
 0x221   : > { %v951_v34 = vadd.f32 %v950_v31, %v949_v33 }
 0x23a   : > { %v1169_v35 = vpop.f32.mrb[2].mxu0 }
 0x23b   : > { %v886_v36 = vadd.f32 %v1169_v35, %v1126_v13  ;;  %v880_v37 = vpop.f32.mrb[3].mxu0 }
 0x23c   : > { %v881_v38 = vadd.f32 %v1126_v13, %v880_v37 }
 0x23d   : > { %913 = vst.msk [vmem:[%s1656_s25 + $0x18] sm:$0xff] %vm909_vm13, %v886_v36  ;;  %v944_v39 = vmul.f32 %v886_v36, %v886_v36  ;;  %v923_v43 = vsel %vm909_vm13, %v886_v36, 0.0 }
 0x23e   : > { %912 = vst.msk [vmem:[%s1656_s25 + $0x10] sm:$0xff] %vm909_vm13, %v881_v38  ;;  %v921_v40 = vsel %vm909_vm13, %v881_v38, 0.0  ;;  %v943_v41 = vmul.f32 %v881_v38, %v881_v38 }
 0x23f   : > { %v922_v42 = vadd.f32 %v921_v40, %v920_v32  ;;  %v954_v47 = vsel %vm909_vm13, %v944_v39, 0.0 }
 0x240   : > { %v952_v44 = vsel %vm909_vm13, %v943_v41, 0.0 }
 0x241   : > { %v953_v45 = vadd.f32 %v952_v44, %v951_v34  ;;  %v924_v46 = vadd.f32 %v923_v43, %v922_v42 }
 0x243   : > { %v955_v48 = vadd.f32 %v954_v47, %v953_v45 }
 0x253   : > { %v1172_v49 = vpop.f32.mrb[0].mxu1 }
 0x254   : > { %v896_v50 = vadd.f32 %v1172_v49, %v1126_v13  ;;  %v890_v51 = vpop.f32.mrb[1].mxu1 }
 0x255   : > { %v891_v52 = vadd.f32 %v1126_v13, %v890_v51 }
 0x256   : > { %915 = vst.msk [vmem:[%s1656_s25 + $0x28] sm:$0xff] %vm909_vm13, %v896_v50  ;;  %v946_v53 = vmul.f32 %v896_v50, %v896_v50  ;;  %v927_v57 = vsel %vm909_vm13, %v896_v50, 0.0 }
 0x257   : > { %914 = vst.msk [vmem:[%s1656_s25 + $0x20] sm:$0xff] %vm909_vm13, %v891_v52  ;;  %v925_v54 = vsel %vm909_vm13, %v891_v52, 0.0  ;;  %v945_v55 = vmul.f32 %v891_v52, %v891_v52 }
 0x258   : > { %v926_v56 = vadd.f32 %v925_v54, %v924_v46  ;;  %v958_v61 = vsel %vm909_vm13, %v946_v53, 0.0 }
 0x259   : > { %v956_v58 = vsel %vm909_vm13, %v945_v55, 0.0 }
 0x25a   : > { %v957_v59 = vadd.f32 %v956_v58, %v955_v48  ;;  %v928_v60 = vadd.f32 %v927_v57, %v926_v56 }
 0x25c   : > { %v959_v62 = vadd.f32 %v958_v61, %v957_v59 }
 0x262   : > { %v1175_v63 = vpop.f32.mrb[2].mxu1 }
 0x263   : > { %v906_v0 = vadd.f32 %v1175_v63, %v1126_v13  ;;  %v900_v1 = vpop.f32.mrb[3].mxu1 }
 0x264   : > { %v901_v2 = vadd.f32 %v1126_v13, %v900_v1 }
 0x265   : > { %917 = vst.msk [vmem:[%s1656_s25 + $0x38] sm:$0xff] %vm909_vm13, %v906_v0  ;;  %v948_v3 = vmul.f32 %v906_v0, %v906_v0  ;;  %v931_v7 = vsel %vm909_vm13, %v906_v0, 0.0 }
 0x266   : > { %916 = vst.msk [vmem:[%s1656_s25 + $0x30] sm:$0xff] %vm909_vm13, %v901_v2  ;;  %v929_v4 = vsel %vm909_vm13, %v901_v2, 0.0  ;;  %v947_v5 = vmul.f32 %v901_v2, %v901_v2  ;;  %s1250_s25 = scalar_lea.vmem %s1249_s16, 32 }
 0x267   : > { %v930_v6 = vadd.f32 %v929_v4, %v928_v60  ;;  %v962_v11 = vsel %vm909_vm13, %v948_v3, 0.0  ;;  %p1252_p2 = scmp.lt.s32.totalorder %s1250_s25, %s1244_s14 }
 0x268   : > { %v960_v8 = vsel %vm909_vm13, %v947_v5, 0.0 }
 0x269   : > { %v932_v9 = vadd.f32 %v931_v7, %v930_v6  ;;  %v961_v10 = vadd.f32 %v960_v8, %v959_v62  ;;  %p1253_p3 = por %p1252_p2, %p1251_p1 }
 0x26b   : > { %v933_v12 = vrot.slane %v932_v9, 4  ;;  %v963_v14 = vadd.f32 %v962_v11, %v961_v10  ;;  %p1254_p4 = pnand %p1253_p3, %p1247_p0 }
 0x26d   : > { %v934_v15 = vadd.f32 %v933_v12, %v932_v9  ;;  %v964_v16 = vrot.slane %v963_v14, 4 }
 0x26f   : > { %v935_v17 = vrot.slane %v934_v15, 2  ;;  %v965_v18 = vadd.f32 %v964_v16, %v963_v14 }
 0x271   : > { %v936_v19 = vadd.f32 %v935_v17, %v934_v15  ;;  %v966_v20 = vrot.slane %v965_v18, 2 }
 0x273   : > { %v937_v21 = vrot.slane %v936_v19, 1  ;;  %v967_v22 = vadd.f32 %v966_v20, %v965_v18 }
 0x275   : > { %v938_v13 = vadd.f32 %v937_v21, %v936_v19  ;;  %v968_v23 = vrot.slane %v967_v22, 1 }
 0x277   : > { %940 = vst.msk [vmem:[%s227_s6] sm:$0x1] %vm939_vm14, %v938_v13  ;;  %v969_v24 = vadd.f32 %v968_v23, %v967_v22 }
 0x278   : > { %1257 = shalt.err (!%p1254_p4)
}
 0x279   : > { %s1258_s30 = scalar_lea.hbm %s1701_s23, 16  ;;  %s1262_s17 = scalar_lea.hbm %s1781_s4, 32 }
 0x27a   : > { %p1259_p7 = scmp.ne.s32.totalorder %s1701_s23, %s1258_s30  ;;  %p1263_p10 = scmp.lt.u32.totalorder %s1701_s23, %s1781_s4 }
 0x27b   : > { %p1264_p11 = scmp.lt.u32.totalorder %s1262_s17, %s1258_s30  ;;  %p1266_p13 = scmp.lt.u32.totalorder %s1258_s30, %s1701_s23 }
 0x27c   : > { %p1260_p8 = pnand %p1259_p7, %p1420_p5 }
 0x27d   : > { %p1265_p12 = por %p1264_p11, %p1263_p10 }
 0x27e   : > { %p1261_p9 = pneg %p1260_p8 }
 0x27f   : > { %p1267_p0 = por %p1266_p13, %p1265_p12 }
 0x281   : > { %p1268_p1 = pnand %p1267_p0, %p1261_p9 }
 0x283   : > { %1271 = shalt.err (!%p1268_p1)
}
 0x284   : > { %1190 = dma.vmem_to_hbm [thread:$0]  (%p1420_p5), %s1703_s7, 16, %s1701_s23, %s977_s13   ;;  %970 = vst.msk [vmem:[%s233_s8] sm:$0x1] %vm939_vm14, %v969_v24 }
 0x285   : > { %s981_s14 = scalar_lea.sflag [#allocation7], %s1691_s26  ;;  %s1272_s15 = scalar_lea.vmem %s1711_s9, 16 }
 0x286   : > { %p1273_p2 = scmp.ne.s32.totalorder %s1711_s9, %s1272_s15  ;;  %s1351_s16 = smov [#allocation6]  }
 0x287   : > { %s1276_s25 = sshll.u32 %s1351_s16, 4  ;;  %s1277_s25 = int_to_ptr.vmem [resolvable:$false] %s1276_s25 }
 0x288   : > { %p1274_p3 = pnand %p1273_p2, %p1420_p5  ;;  %s1278_s30 = scalar_lea.vmem %s1277_s25, 32 }
 0x289   : > { %p1279_p7 = scmp.lt.s32.totalorder %s1711_s9, %s1277_s25  ;;  %p1280_p8 = scmp.lt.s32.totalorder %s1278_s30, %s1272_s15 }
 0x28a   : > { %p1275_p4 = pneg %p1274_p3 }
 0x28b   : > { %p1281_p9 = por %p1280_p8, %p1279_p7 }
 0x28d   : > { %p1282_p10 = pnand %p1281_p9, %p1275_p4 }
 0x28f   : > { %1285 = shalt.err (!%p1282_p10)
}
 0x290   : > { %s1286_s26 = scalar_lea.hbm %s1709_s12, 16  ;;  %s1290_s23 = scalar_lea.hbm %s1782_s5, 32 }
 0x291   : > { %p1287_p11 = scmp.ne.s32.totalorder %s1709_s12, %s1286_s26  ;;  %p1291_p0 = scmp.lt.u32.totalorder %s1709_s12, %s1782_s5 }
 0x292   : > { %p1292_p1 = scmp.lt.u32.totalorder %s1290_s23, %s1286_s26  ;;  %p1294_p3 = scmp.lt.u32.totalorder %s1286_s26, %s1709_s12 }
 0x293   : > { %p1288_p12 = pnand %p1287_p11, %p1420_p5 }
 0x294   : > { %p1293_p2 = por %p1292_p1, %p1291_p0 }
 0x295   : > { %p1289_p13 = pneg %p1288_p12 }
 0x296   : > { %p1295_p4 = por %p1294_p3, %p1293_p2 }
 0x298   : > { %p1296_p7 = pnand %p1295_p4, %p1289_p13 }
 0x29a   : > { %1299 = shalt.err (!%p1296_p7)
}
 0x29b   : > { %1191 = dma.vmem_to_hbm [thread:$0]  (%p1420_p5), %s1711_s9, 16, %s1709_s12, %s981_s14  }
 0x29c PF: > { %p1201_p8 = scmp.ge.s32.totalorder %s1338_s21, 2  ;;  %s1030_s10 = sand.u32 1, %s1326_s18  }
 0x29d   : > { %s1031_s17 = scalar_lea.sflag [#allocation5], %s1030_s10 }
 0x29e   : > { %p1195_p9 = pnand %p1201_p8, %p1424_p6 }
 0x2a0   : > { %1317 = dma.done.wait (!%p1195_p9), %s1031_s17, 16  }
 0x2a1   : > { %1319 = vsyncadd (!%p1195_p9), %s1031_s17, 4294967280  ;;  %s1039_s22 = scalar_lea.sflag [#allocation7], %s1030_s10 }
 0x2a2   : > { %1321 = dma.done.wait (!%p1195_p9), %s1039_s22, 16  }
 0x2a3   : > { %1323 = vsyncadd (!%p1195_p9), %s1039_s22, 4294967280  ;;  %p19_p5 = scmp.ge.s32.totalorder %s1407_s24, 4   ;;  %s1785_s18 = smov %s1330_s19 }
 0x2a4   : > { %s1786_s19 = smov %s1334_s20  ;;  %s1787_s20 = smov %s1418_s27 }
 0x2a5   : > { %s1788_s21 = smov %s1407_s24  ;;  %21 = sbr.rel (!%p19_p5) target bundleno = 5 (0x5), region = 99 }
 0x2ac   :  { %1043 = vsyncpa [#allocation5], 1 }
 0x2ad   :  { %1045 = vsyncpa [#allocation5 + $0x1], 1 }
 0x2ae   :  { %1046 = vsyncpa [#allocation7], 1 }
 0x2af   :  { %1048 = vsyncpa [#allocation7 + $0x1], 1 }

</bundles_post_ra>
